<compile_context>
chip_gen: v7x
topology: tpu7x:2x2x1
jax: 0.10.0
libtpu: 0.0.40
codegen_flags: <defaults>
</compile_context>

<pallas_src>
import jax
import jax.numpy as jnp
import numpy as np
from jax.experimental import pallas as pl
from jax.experimental.pallas import tpu as pltpu


def _round_up(n, m):
    return ((n + m - 1) // m) * m


def length_regulator_kernel(x_ref, start_ref, end_ref, o_ref):
    # x_ref:     (1, T, D)   encoder outputs for this batch element (resident)
    # start_ref: (1, 1, T)   exclusive cumulative duration (interval start)
    # end_ref:   (1, 1, T)   inclusive cumulative duration (interval end)
    # o_ref:     (1, ROWS, D) tile of expanded output frames
    rows = o_ref.shape[1]
    t0 = pl.program_id(1) * rows

    # Output-frame indices for this tile, as a column vector.
    t_ids = t0 + jax.lax.broadcasted_iota(jnp.int32, (rows, 1), 0)   # (ROWS, 1)

    start = start_ref[0]                                             # (1, T)
    end = end_ref[0]                                                 # (1, T)

    # One-hot selection matrix: frame r picks token i iff start_i <= t_r < end_i.
    # Frames beyond mel_len match no interval -> all-zero row -> zero padding.
    onehot = jnp.logical_and(t_ids >= start, t_ids < end)            # (ROWS, T)
    p = onehot.astype(x_ref.dtype)

    x = x_ref[0]                                                     # (T, D)
    o_ref[0] = jnp.dot(p, x, preferred_element_type=jnp.float32).astype(o_ref.dtype)


def length_regulator(x, duration, max_len=None, rows=512):
    """Pallas LengthRegulator. Returns (output (B, max_len, D), mel_len (B,))."""
    B, T, D = x.shape
    duration = duration.astype(jnp.int32)

    csum = jnp.cumsum(duration, axis=1)                 # inclusive cumsum (B, T)
    mel_len = csum[:, -1]                               # (B,) int32

    if max_len is None:
        max_len = max(int(jnp.max(mel_len)), 1)

    # Row tile: large & lane-dense, but never bigger than needed; multiple of 8.
    rows = min(rows, _round_up(max_len, 8))
    padded_len = _round_up(max_len, rows)
    grid_t = padded_len // rows

    cum_end = csum.reshape(B, 1, T)                     # interval end (exclusive frame id bound)
    cum_start = (csum - duration).reshape(B, 1, T)      # interval start

    out = pl.pallas_call(
        length_regulator_kernel,
        out_shape=jax.ShapeDtypeStruct((B, padded_len, D), x.dtype),
        grid=(B, grid_t),
        in_specs=[
            pl.BlockSpec((1, T, D), lambda b, j: (b, 0, 0)),
            pl.BlockSpec((1, 1, T), lambda b, j: (b, 0, 0)),
            pl.BlockSpec((1, 1, T), lambda b, j: (b, 0, 0)),
        ],
        out_specs=pl.BlockSpec((1, rows, D), lambda b, j: (b, j, 0)),
        compiler_params=pltpu.CompilerParams(
            dimension_semantics=("parallel", "parallel")),
    )(x, cum_start, cum_end)

    return out[:, :max_len, :], mel_len


def length_regulator_reference(x, duration, max_len):
    """NumPy mirror of the PyTorch forward."""
    x = np.asarray(x)
    duration = np.asarray(duration)
    B, T, D = x.shape
    out = np.zeros((B, max_len, D), dtype=x.dtype)
    mel_len = np.zeros((B,), dtype=np.int32)
    for b in range(B):
        pos = 0
        for i in range(T):
            d = int(duration[b, i])
            out[b, pos:pos + d] = x[b, i]
            pos += d
        mel_len[b] = pos
    return out, mel_len


if __name__ == "__main__":
    B, T, D = 2, 8, 32

    key = jax.random.PRNGKey(0)
    k_x, k_d = jax.random.split(key, 2)

    x = jax.random.normal(k_x, (B, T, D), jnp.float32)
    duration = jax.random.randint(k_d, (B, T), 0, 5, dtype=jnp.int32)

    out, mel_len = length_regulator(x, duration, max_len=None)
    out = jax.block_until_ready(out)
    mel_len = jax.block_until_ready(mel_len)

    max_len = out.shape[1]
    ref_out, ref_len = length_regulator_reference(x, duration, max_len)

    assert out.shape == (B, max_len, D), out.shape
    assert np.array_equal(np.asarray(mel_len), ref_len), (mel_len, ref_len)
    assert np.allclose(np.asarray(out), ref_out, atol=1e-6, rtol=1e-6), (
        "mismatch vs reference: max abs err "
        f"{float(np.max(np.abs(np.asarray(out) - ref_out)))}")

    print("KERNEL_OK")
</pallas_src>

<mosaic_0001>
module attributes {stable_mosaic.version = 11 : i64} {
  func.func @length_regulator_kernel(%arg0: i32, %arg1: i32, %arg2: memref<1x8x32xf32, #tpu.memory_space<vmem>>, %arg3: memref<1x1x8xi32, #tpu.memory_space<vmem>>, %arg4: memref<1x1x8xi32, #tpu.memory_space<vmem>>, %arg5: memref<1x16x32xf32, #tpu.memory_space<vmem>>) attributes {dimension_semantics = [#tpu.dimension_semantics<parallel>, #tpu.dimension_semantics<parallel>], iteration_bounds = array<i64: 2, 1>, scalar_prefetch = 0 : i64, scratch_operands = 0 : i64, tpu.core_type = #tpu.core_type<tc>, window_params = [{transform_indices = @transform_0, window_bounds = array<i64: 1, 8, 32>}, {transform_indices = @transform_1, window_bounds = array<i64: 1, 1, 8>}, {transform_indices = @transform_2, window_bounds = array<i64: 1, 1, 8>}, {transform_indices = @transform_3, window_bounds = array<i64: 1, 16, 32>}]} {
    %c16_i32 = arith.constant 16 : i32
    %0 = arith.muli %arg1, %c16_i32 : i32
    %1 = tpu.iota {dimensions = array<i32: 0>} : vector<16x1xi32>
    %2 = vector.broadcast %0 : i32 to vector<16x1xi32>
    %3 = arith.addi %2, %1 : vector<16x1xi32>
    %c0 = arith.constant 0 : index
    %c0_0 = arith.constant 0 : index
    %c0_1 = arith.constant 0 : index
    %4 = vector.load %arg3[%c0, %c0_0, %c0_1] : memref<1x1x8xi32, #tpu.memory_space<vmem>>, vector<1x1x8xi32>
    %5 = vector.shape_cast %4 : vector<1x1x8xi32> to vector<1x8xi32>
    %c0_2 = arith.constant 0 : index
    %c0_3 = arith.constant 0 : index
    %c0_4 = arith.constant 0 : index
    %6 = vector.load %arg4[%c0_2, %c0_3, %c0_4] : memref<1x1x8xi32, #tpu.memory_space<vmem>>, vector<1x1x8xi32>
    %7 = vector.shape_cast %6 : vector<1x1x8xi32> to vector<1x8xi32>
    %8 = vector.broadcast %3 : vector<16x1xi32> to vector<16x8xi32>
    %9 = vector.broadcast %5 : vector<1x8xi32> to vector<16x8xi32>
    %10 = arith.cmpi sge, %8, %9 : vector<16x8xi32>
    %11 = vector.broadcast %3 : vector<16x1xi32> to vector<16x8xi32>
    %12 = vector.broadcast %7 : vector<1x8xi32> to vector<16x8xi32>
    %13 = arith.cmpi slt, %11, %12 : vector<16x8xi32>
    %14 = arith.andi %10, %13 : vector<16x8xi1>
    %15 = arith.extui %14 : vector<16x8xi1> to vector<16x8xi32>
    %16 = arith.sitofp %15 : vector<16x8xi32> to vector<16x8xf32>
    %c0_5 = arith.constant 0 : index
    %c0_6 = arith.constant 0 : index
    %c0_7 = arith.constant 0 : index
    %17 = vector.load %arg2[%c0_5, %c0_6, %c0_7] : memref<1x8x32xf32, #tpu.memory_space<vmem>>, vector<1x8x32xf32>
    %18 = vector.shape_cast %17 : vector<1x8x32xf32> to vector<8x32xf32>
    %cst = arith.constant dense<0.000000e+00> : vector<16x32xf32>
    %19 = tpu.matmul %16, %18, %cst {dimension_numbers = #tpu.dot_dimension_numbers<[1], [0], [0], [1], [0, 0, 1, 1], [], []>} : vector<16x8xf32>, vector<8x32xf32>, vector<16x32xf32> -> vector<16x32xf32>
    %c0_8 = arith.constant 0 : index
    %c0_9 = arith.constant 0 : index
    %c0_10 = arith.constant 0 : index
    %20 = vector.load %arg5[%c0_8, %c0_9, %c0_10] : memref<1x16x32xf32, #tpu.memory_space<vmem>>, vector<1x16x32xf32>
    %21 = vector.shape_cast %20 : vector<1x16x32xf32> to vector<16x32xf32>
    %22 = vector.shape_cast %19 : vector<16x32xf32> to vector<1x16x32xf32>
    tpu.vector_store %arg5[%c0_8, %c0_9, %c0_10], %22 {strides = array<i32>} : memref<1x16x32xf32, #tpu.memory_space<vmem>>, vector<1x16x32xf32>,
    return
  }
  func.func @transform_0(%arg0: i32, %arg1: i32) -> (i32, i32, i32) {
    %c0_i32 = arith.constant 0 : i32
    %c0_i32_0 = arith.constant 0 : i32
    %c0_i32_1 = arith.constant 0 : i32
    return %arg0, %c0_i32, %c0_i32_0 : i32, i32, i32
  }
  func.func @transform_1(%arg0: i32, %arg1: i32) -> (i32, i32, i32) {
    %c0_i32 = arith.constant 0 : i32
    %c0_i32_0 = arith.constant 0 : i32
    %c0_i32_1 = arith.constant 0 : i32
    return %arg0, %c0_i32, %c0_i32_0 : i32, i32, i32
  }
  func.func @transform_2(%arg0: i32, %arg1: i32) -> (i32, i32, i32) {
    %c0_i32 = arith.constant 0 : i32
    %c0_i32_0 = arith.constant 0 : i32
    %c0_i32_1 = arith.constant 0 : i32
    return %arg0, %c0_i32, %c0_i32_0 : i32, i32, i32
  }
  func.func @transform_3(%arg0: i32, %arg1: i32) -> (i32, i32, i32) {
    %c0_i32 = arith.constant 0 : i32
    %c0_i32_0 = arith.constant 0 : i32
    return %arg0, %arg1, %c0_i32 : i32, i32, i32
  }
}

</mosaic_0001>

<bundles_post_ra>
// kernel: tpu_custom_call.1
= control target key start
LH: loop header
LB: loop body
LE: loop exit
PB: predicated region body
PF: predicated region fallthrough
CT: control target
= control target key end

     0   :  { %8 = vsyncpa [#allocation3], 0  ;;  %s876_s0 = inlined_call_operand.hbm [shape: f32[2,8,32], index: 0, kind: input, shape index: {}]   ;;  %s877_s1 = inlined_call_operand.vmem [shape: s32[2,1,8], index: 1, kind: input, shape index: {}]   ;;  %s878_s2 = inlined_call_operand.vmem [shape: s32[2,1,8], index: 2, kind: input, shape index: {}]   ;;  %s879_s3 = inlined_call_operand.hbm [shape: f32[2,16,32], index: 3, kind: output, shape index: {}]  }
   0x1   :  { %10 = vsyncpa [#allocation3 + $0x1], 0 }
   0x2   :  { %11 = vsyncpa [#allocation4], 0 }
   0x3   :  { %13 = vsyncpa [#allocation4 + $0x1], 0  ;;  %s693_s12 = smov 0   ;;  %s695_s13 = smov 0  }
   0x4   :  { %s697_s14 = smov 0   ;;  %s699_s15 = smov 0  }
   0x5   :  { %s701_s16 = smov 0   ;;  %s703_s17 = smov 0  }
   0x6 LB: > { %s460_s18 = sadd.s32 4294967295, %s666_s17   ;;  %s461_s19 = sadd.s32 4294967294, %s666_s17   ;;  %s666_s17 = sphi %s703_s17, %s19_s17   ;;  %s662_s16 = sphi %s701_s16, %s895_s16   ;;  %s658_s15 = sphi %s699_s15, %s894_s15   ;;  %s654_s14 = sphi %s697_s14, %s893_s14   ;;  %s650_s13 = sphi %s695_s13, %s892_s13   ;;  %s646_s12 = sphi %s693_s12, %s891_s12  }
   0x7   : > { %s31_s20 = sadd.s32 1, %s662_s16  ;;  %s38_s21 = sadd.s32 1, %s654_s14 }
   0x8   : > { %p33_p0 = scmp.ge.s32.totalorder %s31_s20, 2  ;;  %p45_p1 = scmp.ne.s32.totalorder %s654_s14, %s650_s13 }
   0x9   : > { %p46_p2 = scmp.eq.s32.totalorder %s666_s17, 0  ;;  %p51_p3 = scmp.ne.s32.totalorder %s650_s13, %s646_s12 }
   0xa   : > { %s897_s20 = smov (%p33_p0, %s31_s20), 0  ;;  %p52_p5 = scmp.eq.s32.totalorder %s460_s18, 0 }
   0xb   : > { %p734_p4 = por %p46_p2, %p45_p1  ;;  %s35_s23 = ssub.s32 %s662_s16, %s897_s20 }
   0xc   : > { %p129_p6 = scmp.eq.s32.totalorder %s460_s18, 1  ;;  %p36_p7 = scmp.eq.s32.totalorder %s35_s23, 0 }
   0xd   : > { %p740_p8 = por %p52_p5, %p51_p3  ;;  %p135_p10 = scmp.eq.s32.totalorder %s461_s19, 1 }
   0xe   : > { %p744_p9 = por %p129_p6, %p45_p1  ;;  %p501_p13 = scmp.lt.s32.totalorder %s666_s17, 2 }
   0xf   : > { %s749_s26 = scalar_select %p36_p7, %s654_s14, %s38_s21  }
  0x10   : > { %s883_s25 = scalar_select %p744_p9, 1, 0 }
  0x11   : > { %p751_p11 = por %p135_p10, %p51_p3  ;;  %s155_s28 = sand.u32 1, %s654_s14  }
  0x12   : > { %s464_s29 = sshll.u32 %s155_s28, 3  ;;  %s465_s30 = sshll.u32 %s662_s16, 7 }
  0x13   : > { %s884_s27 = scalar_select %p751_p11, 1, 0 }
  0x14   : > { %s762_s6 = scalar_lea.hbm %s876_s0, %s465_s30  ;;  %s159_s7 = scalar_lea.vmem [#allocation2], %s464_s29 }
  0x15   : > { %s166_s8 = sshll.u32 %s159_s7, 4  ;;  %p768_p0 = pnand %p501_p13, %p734_p4  ;;  %s764_s8 = int_to_ptr.vmem [resolvable:$true] %s166_s8 }
  0x16   : > { %s156_s10 = scalar_lea.sflag [#allocation3], %s155_s28  ;;  %s554_s11 = scalar_lea.hbm %s762_s6, 128 }
  0x17   : > { %p555_p3 = scmp.ne.s32.totalorder %s762_s6, %s554_s11  ;;  %p556_p5 = pneg %p768_p0 }
  0x18   : > { %s559_s21 = scalar_lea.hbm %s876_s0, 256  ;;  %p560_p4 = scmp.lt.u32.totalorder %s762_s6, %s876_s0 }
  0x19   : > { %p557_p6 = pnand %p556_p5, %p555_p3  ;;  %p561_p10 = scmp.lt.u32.totalorder %s559_s21, %s554_s11 }
  0x1a   : > { %p563_p12 = scmp.lt.u32.totalorder %s554_s11, %s762_s6 }
  0x1b   : > { %p558_p7 = pneg %p557_p6  ;;  %p562_p13 = por %p561_p10, %p560_p4 }
  0x1d   : > { %p564_p1 = por %p563_p12, %p562_p13 }
  0x1f   : > { %p565_p2 = pnand %p564_p1, %p558_p7 }
  0x21   : > { %568 = shalt.err (!%p565_p2)
}
  0x22   : > { %s569_s28 = scalar_lea.vmem %s764_s8, 128  ;;  %s668_s29 = smov [#allocation2]  }
  0x23   : > { %p570_p3 = scmp.ne.s32.totalorder %s764_s8, %s569_s28  ;;  %s574_s30 = sshll.u32 %s668_s29, 4  ;;  %s575_s30 = int_to_ptr.vmem [resolvable:$false] %s574_s30 }
  0x24   : > { %s576_s4 = scalar_lea.vmem %s575_s30, 256  ;;  %p577_p9 = scmp.lt.s32.totalorder %s764_s8, %s575_s30 }
  0x25   : > { %p572_p6 = pnand %p570_p3, %p556_p5  ;;  %p578_p4 = scmp.lt.s32.totalorder %s576_s4, %s569_s28 }
  0x27   : > { %p573_p11 = pneg %p572_p6  ;;  %p579_p10 = por %p578_p4, %p577_p9 }
  0x29   : > { %p580_p12 = pnand %p579_p10, %p573_p11 }
  0x2b   : > { %583 = shalt.err (!%p580_p12)
}
  0x2c   : > { %496 = dma.hbm_to_vmem [thread:$0]  (!%p768_p0), %s762_s6, 128, %s764_s8, %s156_s10  }
  0x2d   : > { %p886_p1 = scmp.lt.s32.totalorder %s666_s17, 3  ;;  %p887_p2 = scmp.ge.s32.totalorder %s666_s17, 1 }
  0x2f   : > { %p184_p5 = pnand %p887_p2, %p886_p1 }
  0x30   : > { %s804_s5 = sand.u32 (!%p184_p5), 1, %s650_s13  }
  0x31   : > { %187 = sbr.rel (%p184_p5) target bundleno = 296 (0x128), region = 32  ;;  %s467_s7 = sshll.u32 (!%p184_p5), %s804_s5, 3 }
  0x32   : > { %s190_s11 = scalar_lea.sflag (!%p184_p5), [#allocation3], %s804_s5  ;;  %s193_s18 = scalar_lea.vmem (!%p184_p5), [#allocation2], %s467_s7 }
  0x38   : > { %637 = dma.done.wait (%p740_p8), %s190_s11, 128  }
  0x39   : > { %639 = vsyncadd (%p740_p8), %s190_s11, 4294967168  ;;  %p222_p9 = scmp.lt.s32.totalorder %s658_s15, 1  ;;  %v230_v0 = vlaneseq  ;;  %v256_v3 = vld [vmem:[%s193_s18] sm:$0xff]  ;;  %vm257_vm0 = vcmask 64512   ;;  %v669_v6 = vmov 0.0   ;;  %s468_s24 = sshll.u32 %s804_s5, 4 }
  0x3a   : > { %484 = vmatprep.subr.mxu0 %v256_v3  ;;  %s221_s23 = scalar_lea.vmem [#allocation5], %s468_s24  ;;  %s480_s29 = sshll.u32 %s658_s15, 8  ;;  %vm339_vm7 = vcmask 261120  }
  0x3b   : > { %s223_s6 = scalar_select %p222_p9, %s658_s15, 1  ;;  %v231_v1 = vshrl.u32 %v230_v0, 7  ;;  %485 = vmatpush3.msra.mxu0 %v256_v3 }
  0x3c   : > { %s358_s28 = sshll.u32 %s221_s23, 4  ;;  %s827_s7 = scalar_lea.hbm %s879_s3, %s480_s29  ;;  %s822_s28 = int_to_ptr.vmem [resolvable:$true] %s358_s28 }
  0x3d   : > { %s224_s10 = scalar_lea.vmem %s877_s1, %s223_s6  ;;  %s227_s22 = scalar_lea.vmem %s878_s2, %s223_s6  ;;  %v232_v2 = vadd.s32 8, %v231_v1 }
  0x3e   : > { %v469_v4 = vld [vmem:[%s224_s10] ss:$0 sm:$0xff]  ;;  %s343_s11 = scalar_lea.sflag [#allocation4], %s804_s5  ;;  %s584_s18 = scalar_lea.vmem %s822_s28, 256 }
  0x3f   : > { %v470_v5 = vld [vmem:[%s227_s22] ss:$0 sm:$0xff]  ;;  %vm242_vm1 = vcmp.ge.s32.totalorder %v231_v1, %v469_v4  ;;  %vm243_vm2 = vcmp.ge.s32.totalorder %v232_v2, %v469_v4  ;;  %p585_p8 = scmp.ne.s32.totalorder %s822_s28, %s584_s18  ;;  %p888_p11 = scmp.ne.s32.totalorder %s883_s25, 0 }
  0x40   : > { %vm248_vm3 = vcmp.lt.s32.totalorder %v231_v1, %v470_v5  ;;  %vm249_vm4 = vcmp.lt.s32.totalorder %v232_v2, %v470_v5  ;;  %s670_s15 = smov [#allocation5]  }
  0x41   : > { %vm250_vm5 = vmand %vm242_vm1, %vm248_vm3  ;;  %p586_p0 = pnand %p585_p8, %p888_p11  ;;  %s588_s6 = sshll.u32 %s670_s15, 4  ;;  %s589_s6 = int_to_ptr.vmem [resolvable:$false] %s588_s6 }
  0x42   : > { %vm251_vm6 = vmand %vm243_vm2, %vm249_vm4  ;;  %v471_v7 = vsel %vm250_vm5, 1.0, %v669_v6  ;;  %s590_s8 = scalar_lea.vmem %s589_s6, 512  ;;  %p591_p13 = scmp.lt.s32.totalorder %s822_s28, %s589_s6 }
  0x43   : > { %v472_v8 = vsel %vm251_vm6, 1.0, %v669_v6  ;;  %486 = vmatprep.mubr.msk.f32.mxu0 %vm257_vm0, %v471_v7  ;;  %p587_p7 = pneg %p586_p0  ;;  %p592_p3 = scmp.lt.s32.totalorder %s590_s8, %s584_s18 }
  0x44   : > { %487 = vmatmul.mubr.msk.f32.vlgmr.msra.gmra.mrb[0].mxu0 %vm257_vm0, %v472_v8 }
  0x45   : > { %p593_p6 = por %p592_p3, %p591_p13 }
  0x47   : > { %p594_p4 = pnand %p593_p6, %p587_p7 }
 0x117   : > { %v488_v9 = vpop.f32.mrb[0].mxu0 }
 0x118   : > { %341 = vst.msk [vmem:[%s221_s23 + $0x8] sm:$0xff] %vm339_vm7, %v488_v9  ;;  %v330_v10 = vpop.f32.mrb[1].mxu0 }
 0x119   : > { %340 = vst.msk [vmem:[%s221_s23] sm:$0xff] %vm339_vm7, %v330_v10 }
 0x11a   : > { %597 = shalt.err (!%p594_p4)
}
 0x11b   : > { %s598_s9 = scalar_lea.hbm %s827_s7, 256  ;;  %s602_s21 = scalar_lea.hbm %s879_s3, 512 }
 0x11c   : > { %p599_p10 = scmp.ne.s32.totalorder %s827_s7, %s598_s9  ;;  %p603_p2 = scmp.lt.u32.totalorder %s827_s7, %s879_s3 }
 0x11d   : > { %p604_p5 = scmp.lt.u32.totalorder %s602_s21, %s598_s9  ;;  %p606_p8 = scmp.lt.u32.totalorder %s598_s9, %s827_s7 }
 0x11e   : > { %p600_p12 = pnand %p599_p10, %p888_p11 }
 0x11f   : > { %p605_p9 = por %p604_p5, %p603_p2 }
 0x120   : > { %p601_p1 = pneg %p600_p12 }
 0x121   : > { %p607_p0 = por %p606_p8, %p605_p9 }
 0x123   : > { %p608_p7 = pnand %p607_p0, %p601_p1 }
 0x125   : > { %611 = shalt.err (!%p608_p7)
}
 0x126   : > { %s671_s23 = smov 128   ;;  %s672_s29 = smov 8  }
 0x127   : > { %491 = dma.vmem_to_hbm [thread:$0]  (%p888_p11), %s822_s28, 256, %s827_s7, %s343_s11, %s671_s23, %s671_s23, %s672_s29  }
 0x128 PF: > { %s373_s30 = sand.u32 1, %s646_s12   ;;  %p889_p13 = scmp.ne.s32.totalorder %s884_s27, 0 }
 0x129   : > { %p890_p3 = scmp.ge.s32.totalorder %s666_s17, 2  ;;  %s374_s4 = scalar_lea.sflag [#allocation4], %s373_s30 }
 0x12b   : > { %p498_p6 = pnand %p890_p3, %p889_p13 }
 0x12d   : > { %641 = dma.done.wait (!%p498_p6), %s374_s4, 256  }
 0x12e   : > { %643 = vsyncadd (!%p498_p6), %s374_s4, 4294967040  ;;  %s19_s17 = sadd.s32 1, %s666_s17   ;;  %s891_s12 = smov %s650_s13 }
 0x12f   : > { %p16_p4 = scmp.ge.s32.totalorder %s19_s17, 4   ;;  %s892_s13 = smov %s654_s14 }
 0x130   : > { %s893_s14 = smov %s749_s26  ;;  %s894_s15 = smov %s662_s16 }
 0x131   : > { %s895_s16 = smov %s897_s20  ;;  %18 = sbr.rel (!%p16_p4) target bundleno = 6 (0x6), region = 83 }
 0x138   :  { %379 = vsyncpa [#allocation3], 1 }
 0x139   :  { %381 = vsyncpa [#allocation3 + $0x1], 1 }
 0x13a   :  { %382 = vsyncpa [#allocation4], 1 }
 0x13b   :  { %384 = vsyncpa [#allocation4 + $0x1], 1 }

</bundles_post_ra>
